<compile_context>
chip_gen: v6e
topology: v6e:2x2x1
jax: 0.10.0
libtpu: 0.0.40
codegen_flags: <defaults>
</compile_context>

<pallas_src>
import jax
import jax.numpy as jnp
from jax import lax
from jax.experimental import pallas as pl
from jax.experimental.pallas import tpu as pltpu

HIDDEN = 256
TILE_B = 2048      # max batch rows per grid step
SUB = 256          # in-kernel sub-chunk size (bounds f32 intermediates)


def _round_up(x, m):
    return ((x + m - 1) // m) * m


def discriminator_kernel(x_ref, w1_ref, b1_ref, w2_ref, b2_ref, w3_ref, b3_ref,
                         o_ref):
    # Weights / biases are small and block == array; load once per grid step.
    w1 = w1_ref[...]
    b1 = b1_ref[...]
    w2 = w2_ref[...]
    b2 = b2_ref[...]
    w3 = w3_ref[...]
    b3 = b3_ref[...]

    def mlp(x_bf16):
        # Layer 1: Linear + ReLU (bf16 MXU operands, f32 accumulate).
        h1 = jnp.dot(x_bf16, w1, preferred_element_type=jnp.float32)
        h1 = jnp.maximum(h1 + b1, 0.0)
        # Layer 2: Linear + Sigmoid.
        h2 = jnp.dot(h1.astype(jnp.bfloat16), w2,
                     preferred_element_type=jnp.float32)
        h2 = jax.nn.sigmoid(h2 + b2)
        # Layer 3: Linear + Sigmoid (output width == d_out, unpadded).
        h3 = jnp.dot(h2.astype(jnp.bfloat16), w3,
                     preferred_element_type=jnp.float32)
        return jax.nn.sigmoid(h3 + b3)

    block_b = x_ref.shape[0]
    if block_b <= SUB:
        # Single chunk: static full-block load / store.
        o_ref[...] = mlp(x_ref[...].astype(jnp.bfloat16))
    else:
        # block_b is a multiple of SUB by construction (see wrapper); bound the
        # live (sub, 256) f32 intermediates per iteration.
        n_sub = block_b // SUB

        def body(i, carry):
            start = pl.multiple_of(i * SUB, SUB)
            xb = x_ref[pl.ds(start, SUB), :].astype(jnp.bfloat16)
            o_ref[pl.ds(start, SUB), :] = mlp(xb)
            return carry

        lax.fori_loop(0, n_sub, body, 0, unroll=True)


@jax.jit
def discriminator_forward(x, prepared):
    """x: (B, input_size) float32. prepared: output of prepare_params.
    Returns (B, output_size) float32 probabilities."""
    assert x.ndim == 2, f"wrong shape, got {x.shape}"
    w1, b1, w2, b2, w3, b3 = prepared
    B, D_in = x.shape
    d_out = w3.shape[1]

    if B <= SUB:
        block_b = B                          # single tile; block == array dims
    else:
        # >= 2 tiles when B permits (v7x megacore), 256-row aligned, <= TILE_B.
        block_b = min(TILE_B, _round_up(pl.cdiv(B, 2), SUB))
    grid = (pl.cdiv(B, block_b),)

    x_map = lambda i: (i, 0)     # tile over batch
    w_map = lambda i: (0, 0)     # weights/biases resident across batch tiles

    return pl.pallas_call(
        discriminator_kernel,
        out_shape=jax.ShapeDtypeStruct((B, d_out), jnp.float32),
        grid=grid,
        in_specs=[
            pl.BlockSpec((block_b, D_in), x_map),
            pl.BlockSpec(w1.shape, w_map),
            pl.BlockSpec(b1.shape, w_map),
            pl.BlockSpec(w2.shape, w_map),
            pl.BlockSpec(b2.shape, w_map),
            pl.BlockSpec(w3.shape, w_map),
            pl.BlockSpec(b3.shape, w_map),
        ],
        out_specs=pl.BlockSpec((block_b, d_out), x_map),
        compiler_params=pltpu.CompilerParams(
            dimension_semantics=("parallel",)),
    )(x, w1, b1, w2, b2, w3, b3)


def prepare_params(params):
    """One-time conversion of f32 (in, out) params into TPU-friendly operands:
    weights cast to bf16 for the MXU, biases kept f32 as (1, N) rows."""
    w1, b1, w2, b2, w3, b3 = params
    return (
        w1.astype(jnp.bfloat16),
        b1.reshape(1, -1).astype(jnp.float32),
        w2.astype(jnp.bfloat16),
        b2.reshape(1, -1).astype(jnp.float32),
        w3.astype(jnp.bfloat16),
        b3.reshape(1, -1).astype(jnp.float32),
    )


def init_params(key, input_size, output_size):
    """Deterministic init mirroring torch.nn.Linear defaults:
       W, b ~ U(-1/sqrt(fan_in), 1/sqrt(fan_in)). Weights stored as (in, out)."""
    ks = jax.random.split(key, 6)

    def lin(kw, kb, fan_in, fan_out):
        bound = 1.0 / jnp.sqrt(jnp.float32(fan_in))
        w = jax.random.uniform(kw, (fan_in, fan_out), jnp.float32, -bound, bound)
        b = jax.random.uniform(kb, (fan_out,), jnp.float32, -bound, bound)
        return w, b

    w1, b1 = lin(ks[0], ks[1], input_size, HIDDEN)
    w2, b2 = lin(ks[2], ks[3], HIDDEN, HIDDEN)
    w3, b3 = lin(ks[4], ks[5], HIDDEN, output_size)
    return (w1, b1, w2, b2, w3, b3)


def _reference(x, params):
    w1, b1, w2, b2, w3, b3 = params
    h = jax.nn.relu(x @ w1 + b1)
    h = jax.nn.sigmoid(h @ w2 + b2)
    return jax.nn.sigmoid(h @ w3 + b3)


if __name__ == "__main__":
    key = jax.random.PRNGKey(0)
    k_x, k_x2, k_p = jax.random.split(key, 3)

    input_size = 32   # e.g. state(+skill) feature dim
    output_size = 8   # number of skills

    params = init_params(k_p, input_size, output_size)
    prepared = prepare_params(params)

    # Small demo batch (single-tile path, block == full array dims).
    x = jax.random.normal(k_x, (2, input_size), jnp.float32)
    out = jax.block_until_ready(discriminator_forward(x, prepared))
    ref = _reference(x, params)
    assert out.shape == (2, output_size), out.shape
    max_diff = jnp.max(jnp.abs(out - ref))
    # bf16 MXU operands with f32 accumulation vs full-f32 reference.
    assert jnp.allclose(out, ref, atol=2e-2, rtol=2e-2), \
        f"mismatch vs reference (max abs diff {max_diff})"

    # Ragged multi-tile batch: exercises the >=2-tile grid and the partial
    # (masked) last output block.
    x2 = jax.random.normal(k_x2, (300, input_size), jnp.float32)
    out2 = jax.block_until_ready(discriminator_forward(x2, prepared))
    ref2 = _reference(x2, params)
    assert out2.shape == (300, output_size), out2.shape
    max_diff2 = jnp.max(jnp.abs(out2 - ref2))
    assert jnp.allclose(out2, ref2, atol=2e-2, rtol=2e-2), \
        f"mismatch vs reference on ragged batch (max abs diff {max_diff2})"

    print("KERNEL_OK")
</pallas_src>

<mosaic_0001>
module attributes {stable_mosaic.version = 11 : i64} {
  func.func @discriminator_kernel(%arg0: i32, %arg1: memref<2x32xf32, #tpu.memory_space<vmem>>, %arg2: memref<32x256xbf16, #tpu.memory_space<vmem>>, %arg3: memref<1x256xf32, #tpu.memory_space<vmem>>, %arg4: memref<256x256xbf16, #tpu.memory_space<vmem>>, %arg5: memref<1x256xf32, #tpu.memory_space<vmem>>, %arg6: memref<256x8xbf16, #tpu.memory_space<vmem>>, %arg7: memref<1x8xf32, #tpu.memory_space<vmem>>, %arg8: memref<2x8xf32, #tpu.memory_space<vmem>>) attributes {dimension_semantics = [#tpu.dimension_semantics<parallel>], iteration_bounds = array<i64: 1>, scalar_prefetch = 0 : i64, scratch_operands = 0 : i64, tpu.core_type = #tpu.core_type<tc>, window_params = [{transform_indices = @transform_0, window_bounds = array<i64: 2, 32>}, {pipeline_mode = #tpu.pipeline_mode<synchronous>, transform_indices = @transform_1, window_bounds = array<i64: 32, 256>}, {pipeline_mode = #tpu.pipeline_mode<synchronous>, transform_indices = @transform_2, window_bounds = array<i64: 1, 256>}, {pipeline_mode = #tpu.pipeline_mode<synchronous>, transform_indices = @transform_3, window_bounds = array<i64: 256, 256>}, {pipeline_mode = #tpu.pipeline_mode<synchronous>, transform_indices = @transform_4, window_bounds = array<i64: 1, 256>}, {pipeline_mode = #tpu.pipeline_mode<synchronous>, transform_indices = @transform_5, window_bounds = array<i64: 256, 8>}, {pipeline_mode = #tpu.pipeline_mode<synchronous>, transform_indices = @transform_6, window_bounds = array<i64: 1, 8>}, {transform_indices = @transform_7, window_bounds = array<i64: 2, 8>}]} {
    %c0 = arith.constant 0 : index
    %c0_0 = arith.constant 0 : index
    %0 = vector.load %arg2[%c0, %c0_0] : memref<32x256xbf16, #tpu.memory_space<vmem>>, vector<32x256xbf16>
    %c0_1 = arith.constant 0 : index
    %c0_2 = arith.constant 0 : index
    %1 = vector.load %arg3[%c0_1, %c0_2] : memref<1x256xf32, #tpu.memory_space<vmem>>, vector<1x256xf32>
    %c0_3 = arith.constant 0 : index
    %c0_4 = arith.constant 0 : index
    %2 = vector.load %arg4[%c0_3, %c0_4] : memref<256x256xbf16, #tpu.memory_space<vmem>>, vector<256x256xbf16>
    %c0_5 = arith.constant 0 : index
    %c0_6 = arith.constant 0 : index
    %3 = vector.load %arg5[%c0_5, %c0_6] : memref<1x256xf32, #tpu.memory_space<vmem>>, vector<1x256xf32>
    %c0_7 = arith.constant 0 : index
    %c0_8 = arith.constant 0 : index
    %4 = vector.load %arg6[%c0_7, %c0_8] : memref<256x8xbf16, #tpu.memory_space<vmem>>, vector<256x8xbf16>
    %c0_9 = arith.constant 0 : index
    %c0_10 = arith.constant 0 : index
    %5 = vector.load %arg7[%c0_9, %c0_10] : memref<1x8xf32, #tpu.memory_space<vmem>>, vector<1x8xf32>
    %c0_11 = arith.constant 0 : index
    %c0_12 = arith.constant 0 : index
    %6 = vector.load %arg1[%c0_11, %c0_12] : memref<2x32xf32, #tpu.memory_space<vmem>>, vector<2x32xf32>
    %7 = arith.truncf %6 : vector<2x32xf32> to vector<2x32xbf16>
    %cst = arith.constant dense<0.000000e+00> : vector<2x256xf32>
    %8 = tpu.matmul %7, %0, %cst {dimension_numbers = #tpu.dot_dimension_numbers<[1], [0], [0], [1], [0, 0, 1, 1], [], []>} : vector<2x32xbf16>, vector<32x256xbf16>, vector<2x256xf32> -> vector<2x256xf32>
    %9 = vector.broadcast %1 : vector<1x256xf32> to vector<2x256xf32>
    %10 = arith.addf %8, %9 : vector<2x256xf32>
    %cst_13 = arith.constant 0.000000e+00 : f32
    %11 = vector.broadcast %cst_13 : f32 to vector<2x256xf32>
    %12 = arith.maximumf %10, %11 : vector<2x256xf32>
    %13 = arith.truncf %12 : vector<2x256xf32> to vector<2x256xbf16>
    %cst_14 = arith.constant dense<0.000000e+00> : vector<2x256xf32>
    %14 = tpu.matmul %13, %2, %cst_14 {dimension_numbers = #tpu.dot_dimension_numbers<[1], [0], [0], [1], [0, 0, 1, 1], [], []>} : vector<2x256xbf16>, vector<256x256xbf16>, vector<2x256xf32> -> vector<2x256xf32>
    %15 = vector.broadcast %3 : vector<1x256xf32> to vector<2x256xf32>
    %16 = arith.addf %14, %15 : vector<2x256xf32>
    %17 = arith.negf %16 : vector<2x256xf32>
    %18 = math.exp %17 : vector<2x256xf32>
    %cst_15 = arith.constant 1.000000e+00 : f32
    %19 = vector.broadcast %cst_15 : f32 to vector<2x256xf32>
    %20 = arith.addf %19, %18 : vector<2x256xf32>
    %21 = arith.divf %19, %20 : vector<2x256xf32>
    %22 = arith.truncf %21 : vector<2x256xf32> to vector<2x256xbf16>
    %cst_16 = arith.constant dense<0.000000e+00> : vector<2x8xf32>
    %23 = tpu.matmul %22, %4, %cst_16 {dimension_numbers = #tpu.dot_dimension_numbers<[1], [0], [0], [1], [0, 0, 1, 1], [], []>} : vector<2x256xbf16>, vector<256x8xbf16>, vector<2x8xf32> -> vector<2x8xf32>
    %24 = vector.broadcast %5 : vector<1x8xf32> to vector<2x8xf32>
    %25 = arith.addf %23, %24 : vector<2x8xf32>
    %26 = arith.negf %25 : vector<2x8xf32>
    %27 = math.exp %26 : vector<2x8xf32>
    %cst_17 = arith.constant 1.000000e+00 : f32
    %28 = vector.broadcast %cst_17 : f32 to vector<2x8xf32>
    %29 = arith.addf %28, %27 : vector<2x8xf32>
    %30 = arith.divf %28, %29 : vector<2x8xf32>
    %c0_18 = arith.constant 0 : index
    %c0_19 = arith.constant 0 : index
    %31 = vector.load %arg8[%c0_18, %c0_19] : memref<2x8xf32, #tpu.memory_space<vmem>>, vector<2x8xf32>
    tpu.vector_store %arg8[%c0_18, %c0_19], %30 {strides = array<i32>} : memref<2x8xf32, #tpu.memory_space<vmem>>, vector<2x8xf32>,
    return
  }
  func.func @transform_0(%arg0: i32) -> (i32, i32) {
    %c0_i32 = arith.constant 0 : i32
    %c0_i32_0 = arith.constant 0 : i32
    return %arg0, %c0_i32 : i32, i32
  }
  func.func @transform_1(%arg0: i32) -> (i32, i32) {
    %c0_i32 = arith.constant 0 : i32
    %c0_i32_0 = arith.constant 0 : i32
    %c0_i32_1 = arith.constant 0 : i32
    return %c0_i32, %c0_i32_0 : i32, i32
  }
  func.func @transform_2(%arg0: i32) -> (i32, i32) {
    %c0_i32 = arith.constant 0 : i32
    %c0_i32_0 = arith.constant 0 : i32
    %c0_i32_1 = arith.constant 0 : i32
    return %c0_i32, %c0_i32_0 : i32, i32
  }
  func.func @transform_3(%arg0: i32) -> (i32, i32) {
    %c0_i32 = arith.constant 0 : i32
    %c0_i32_0 = arith.constant 0 : i32
    %c0_i32_1 = arith.constant 0 : i32
    return %c0_i32, %c0_i32_0 : i32, i32
  }
  func.func @transform_4(%arg0: i32) -> (i32, i32) {
    %c0_i32 = arith.constant 0 : i32
    %c0_i32_0 = arith.constant 0 : i32
    %c0_i32_1 = arith.constant 0 : i32
    return %c0_i32, %c0_i32_0 : i32, i32
  }
  func.func @transform_5(%arg0: i32) -> (i32, i32) {
    %c0_i32 = arith.constant 0 : i32
    %c0_i32_0 = arith.constant 0 : i32
    %c0_i32_1 = arith.constant 0 : i32
    return %c0_i32, %c0_i32_0 : i32, i32
  }
  func.func @transform_6(%arg0: i32) -> (i32, i32) {
    %c0_i32 = arith.constant 0 : i32
    %c0_i32_0 = arith.constant 0 : i32
    %c0_i32_1 = arith.constant 0 : i32
    return %c0_i32, %c0_i32_0 : i32, i32
  }
  func.func @transform_7(%arg0: i32) -> (i32, i32) {
    %c0_i32 = arith.constant 0 : i32
    %c0_i32_0 = arith.constant 0 : i32
    return %arg0, %c0_i32 : i32, i32
  }
}

</mosaic_0001>

<bundles_post_ra>
// kernel: discriminator_forward.1
= control target key start
LH: loop header
LB: loop body
LE: loop exit
PB: predicated region body
PF: predicated region fallthrough
CT: control target
= control target key end

     0   :  { %12 = vsyncpa [#allocation3], 0  ;;  %s919_s0 = inlined_call_operand.vmem [shape: f32[2,32], index: 0, kind: input, shape index: {}]   ;;  %s920_s1 = inlined_call_operand.vmem [shape: bf16[32,256], index: 1, kind: input, shape index: {}]   ;;  %s921_s2 = inlined_call_operand.vmem [shape: f32[1,256], index: 2, kind: input, shape index: {}]   ;;  %s922_s3 = inlined_call_operand.hbm [shape: bf16[256,256], index: 3, kind: input, shape index: {}]   ;;  %s923_s4 = inlined_call_operand.vmem [shape: f32[1,256], index: 4, kind: input, shape index: {}]   ;;  %s924_s5 = inlined_call_operand.vmem [shape: bf16[256,8], index: 5, kind: input, shape index: {}]   ;;  %s925_s6 = inlined_call_operand.vmem [shape: f32[1,8], index: 6, kind: input, shape index: {}]   ;;  %s926_s7 = inlined_call_operand.hbm [shape: f32[2,8], index: 7, kind: output, shape index: {}]  }
   0x1   :  { %13 = vsyncpa [#allocation4], 0  ;;  %s796_s24 = smov [#allocation2]  }
   0x2   :  { %s25_s25 = sshll.u32 %s796_s24, 4  ;;  %s26_s25 = int_to_ptr.vmem [resolvable:$true] %s25_s25 }
   0x3   :  { %s760_s26 = scalar_lea.vmem %s26_s25, 4096  ;;  %p765_p1 = scmp.lt.s32.totalorder %s26_s25, %s26_s25 }
   0x4   :  { %p761_p0 = scmp.ne.s32.totalorder %s26_s25, %s760_s26  ;;  %p766_p2 = scmp.lt.s32.totalorder %s760_s26, %s760_s26 }
   0x6   :  { %p767_p3 = por %p766_p2, %p765_p1 }
   0x8   :  { %p768_p4 = pnand %p767_p3, %p761_p0 }
   0xa   :  { %771 = shalt.err (!%p768_p4)
}
   0xb   :  { %s797_s27 = smov 128   ;;  %s798_s28 = smov 8  }
   0xc   :  { %31 = dma.hbm_to_vmem [thread:$0]  %s922_s3, 4096, %s26_s25, [#allocation3], %s797_s27, %s797_s27, %s798_s28  }
   0xd   :  { %792 = dma.done.wait [#allocation3], 4096  }
   0xe   :  { %793 = vsyncadd [#allocation3], 4294963200  ;;  %v799_v0 = vmov 0   ;;  %v670_v1 = vld [vmem:[%s920_s1 + $0x14] ss:$8 sps:$4 sm:$0xff]   ;;  %vm146_vm0 = vcmask 261120   ;;  %v116_v39 = vlaneseq }
   0xf   :  { %182 = vmatprep.mubr.bf16.mxu0 %v799_v0  ;;  %v672_v2 = vld [vmem:[%s920_s1 + $0x10] ss:$8 sps:$4 sm:$0xff]   ;;  %162 = vmatprep.subr.bf16.mxu0 %v670_v1  ;;  %v673_v3 = vld [vmem:[%s920_s1 + $0x4] ss:$8 sps:$4 sm:$0xff]   ;;  %v675_v4 = vld [vmem:[%s920_s1] ss:$8 sps:$4 sm:$0xff]  }
  0x10   :  { %v113_v5 = vld [vmem:[%s919_s0] sm:$0x3]  ;;  %163 = vmatpush1.bf16.msra.mxu0 %v672_v2  ;;  %v676_v6 = vld [vmem:[#allocation2 + $0x74] ss:$8 sps:$4 sm:$0xff]   ;;  %v678_v7 = vld [vmem:[#allocation2 + $0x70] ss:$8 sps:$4 sm:$0xff]  }
  0x11   :  { %164 = vmatprep.subr.bf16.mxu0 %v673_v3  ;;  %366 = vmatprep.subr.bf16.mxu1 %v676_v6  ;;  %v679_v8 = vld [vmem:[#allocation2 + $0x64] ss:$8 sps:$4 sm:$0xff]   ;;  %v114_v9 = vpack.c.bf16 %v113_v5, %v113_v5  ;;  %v681_v10 = vld [vmem:[#allocation2 + $0x60] ss:$8 sps:$4 sm:$0xff]   ;;  %v682_v11 = vld [vmem:[#allocation2 + $0x54] ss:$8 sps:$4 sm:$0xff]  }
  0x12   :  { %367 = vmatpush1.bf16.msra.mxu1 %v678_v7  ;;  %v684_v12 = vld [vmem:[#allocation2 + $0x50] ss:$8 sps:$4 sm:$0xff]   ;;  %v685_v13 = vld [vmem:[#allocation2 + $0x44] ss:$8 sps:$4 sm:$0xff]   ;;  %v687_v14 = vld [vmem:[#allocation2 + $0x40] ss:$8 sps:$4 sm:$0xff]  }
  0x13   :  { %368 = vmatprep.subr.bf16.mxu1 %v679_v8  ;;  %v688_v15 = vld [vmem:[#allocation2 + $0x34] ss:$8 sps:$4 sm:$0xff]   ;;  %v690_v16 = vld [vmem:[#allocation2 + $0x30] ss:$8 sps:$4 sm:$0xff]   ;;  %v691_v17 = vld [vmem:[#allocation2 + $0x24] ss:$8 sps:$4 sm:$0xff]  }
  0x14   :  { %165 = vmatpush1.bf16.msra.mxu0 %v675_v4  ;;  %v693_v18 = vld [vmem:[#allocation2 + $0x20] ss:$8 sps:$4 sm:$0xff]   ;;  %v694_v19 = vld [vmem:[#allocation2 + $0x14] ss:$8 sps:$4 sm:$0xff]   ;;  %v696_v20 = vld [vmem:[#allocation2 + $0x10] ss:$8 sps:$4 sm:$0xff]  }
  0x15   :  { %v697_v21 = vld [vmem:[#allocation2 + $0x4] ss:$8 sps:$4 sm:$0xff]   ;;  %v699_v22 = vld [vmem:[#allocation2] ss:$8 sps:$4 sm:$0xff]   ;;  %v700_v23 = vld [vmem:[#allocation2 + $0xf4] ss:$8 sps:$4 sm:$0xff]  }
  0x16   :  { %369 = vmatpush1.bf16.msra.mxu1 %v681_v10  ;;  %v702_v24 = vld [vmem:[#allocation2 + $0xf0] ss:$8 sps:$4 sm:$0xff]   ;;  %v703_v25 = vld [vmem:[#allocation2 + $0xe4] ss:$8 sps:$4 sm:$0xff]   ;;  %v705_v26 = vld [vmem:[#allocation2 + $0xe0] ss:$8 sps:$4 sm:$0xff]  }
  0x17   :  { %590 = vmatmul.mubr.msk.bf16.vlgmr.msra.gmra.mxu0 %vm146_vm0, %v114_v9  ;;  %370 = vmatprep.subr.bf16.mxu1 %v682_v11  ;;  %v706_v27 = vld [vmem:[#allocation2 + $0xd4] ss:$8 sps:$4 sm:$0xff]   ;;  %v708_v28 = vld [vmem:[#allocation2 + $0xd0] ss:$8 sps:$4 sm:$0xff]   ;;  %v709_v29 = vld [vmem:[#allocation2 + $0xc4] ss:$8 sps:$4 sm:$0xff]  }
  0x18   :  { %v711_v30 = vld [vmem:[#allocation2 + $0xc0] ss:$8 sps:$4 sm:$0xff]   ;;  %v712_v31 = vld [vmem:[#allocation2 + $0xb4] ss:$8 sps:$4 sm:$0xff]   ;;  %v714_v32 = vld [vmem:[#allocation2 + $0xb0] ss:$8 sps:$4 sm:$0xff]  }
  0x19   :  { %v715_v33 = vld [vmem:[#allocation2 + $0xa4] ss:$8 sps:$4 sm:$0xff]   ;;  %v717_v34 = vld [vmem:[#allocation2 + $0xa0] ss:$8 sps:$4 sm:$0xff]   ;;  %v718_v35 = vld [vmem:[#allocation2 + $0x94] ss:$8 sps:$4 sm:$0xff]  }
  0x1a   :  { %371 = vmatpush1.bf16.msra.mxu1 %v684_v12  ;;  %v720_v36 = vld [vmem:[#allocation2 + $0x90] ss:$8 sps:$4 sm:$0xff]   ;;  %v721_v37 = vld [vmem:[#allocation2 + $0x84] ss:$8 sps:$4 sm:$0xff]   ;;  %v723_v38 = vld [vmem:[#allocation2 + $0x80] ss:$8 sps:$4 sm:$0xff]  }
  0x1b   :  { %372 = vmatprep.subr.bf16.mxu1 %v685_v13  ;;  %v117_v40 = vshrl.u32 %v116_v39, 7  ;;  %v46_v42 = vld [vmem:[%s921_s2] sm:$0x3]  ;;  %v724_v56 = vld [vmem:[%s924_s5 + $0x78] sm:$0xff]   ;;  %v726_v58 = vld [vmem:[%s924_s5 + $0x70] sm:$0xff]   ;;  %s800_s23 = smov [#allocation5]  }
  0x1c   :  { %v725_v57 = vld [vmem:[%s924_s5 + $0x38] sm:$0xff]   ;;  %643 = vmatprep.subr.bf16.mxu0 %v724_v56  ;;  %v727_v59 = vld [vmem:[%s924_s5 + $0x30] sm:$0xff]   ;;  %v728_v60 = vld [vmem:[%s924_s5 + $0x68] sm:$0xff]   ;;  %s577_s24 = sshll.u32 %s800_s23, 4  ;;  %vm569_vm1 = vcmask 58368   ;;  %s578_s24 = int_to_ptr.vmem [resolvable:$true] %s577_s24 }
  0x1d   :  { %v118_v41 = vsub.s32 0, %v117_v40  ;;  %v122_v43 = vsub.s32 1, %v117_v40  ;;  %644 = vmatpush3.bf16.msra.mxu0 %v725_v57  ;;  %v729_v61 = vld [vmem:[%s924_s5 + $0x28] sm:$0xff]   ;;  %v730_v62 = vld [vmem:[%s924_s5 + $0x60] sm:$0xff]   ;;  %v732_v0 = vld [vmem:[%s924_s5 + $0x58] sm:$0xff]   ;;  %s772_s25 = scalar_lea.vmem %s578_s24, 32  ;;  %p777_p6 = scmp.lt.s32.totalorder %s578_s24, %s578_s24 }
  0x1e   :  { %373 = vmatpush1.bf16.msra.mxu1 %v687_v14  ;;  %645 = vmatprep.subr.bf16.mxu0 %v726_v58  ;;  %v731_v63 = vld [vmem:[%s924_s5 + $0x20] sm:$0xff]   ;;  %v733_v1 = vld [vmem:[%s924_s5 + $0x18] sm:$0xff]   ;;  %v734_v2 = vld [vmem:[%s924_s5 + $0x50] sm:$0xff]   ;;  %p773_p5 = scmp.ne.s32.totalorder %s578_s24, %s772_s25  ;;  %p778_p7 = scmp.lt.s32.totalorder %s772_s25, %s772_s25 }
  0x1f   :  { %374 = vmatprep.subr.bf16.mxu1 %v688_v15  ;;  %v119_v44 = vrot.slane %v46_v42, %v118_v41  ;;  %v123_v45 = vrot.slane %v46_v42, %v122_v43  ;;  %v735_v3 = vld [vmem:[%s924_s5 + $0x10] sm:$0xff]   ;;  %v736_v4 = vld [vmem:[%s924_s5 + $0x48] sm:$0xff]   ;;  %v738_v6 = vld [vmem:[%s924_s5 + $0x40] sm:$0xff]  }
  0x20   :  { %v737_v5 = vld [vmem:[%s924_s5 + $0x8] sm:$0xff]   ;;  %v739_v7 = vld [vmem:[%s924_s5] sm:$0xff]   ;;  %p779_p8 = por %p778_p7, %p777_p6 }
  0x21   :  { %646 = vmatpush3.bf16.msra.mxu0 %v727_v59  ;;  %v79_v8 = vld [vmem:[%s923_s4] sm:$0x3] }
  0x22   :  { %375 = vmatpush1.bf16.msra.mxu1 %v690_v16  ;;  %647 = vmatprep.subr.bf16.mxu0 %v728_v60  ;;  %v199_v9 = vrot.slane %v79_v8, %v118_v41  ;;  %v203_v10 = vrot.slane %v79_v8, %v122_v43  ;;  %p780_p9 = pnand %p779_p8, %p773_p5 }
  0x23   :  { %376 = vmatprep.subr.bf16.mxu1 %v691_v17 }
  0x25   :  { %648 = vmatpush3.bf16.msra.mxu0 %v729_v61 }
  0x26   :  { %377 = vmatpush1.bf16.msra.mxu1 %v693_v18  ;;  %649 = vmatprep.subr.bf16.mxu0 %v730_v62 }
  0x27   :  { %378 = vmatprep.subr.bf16.mxu1 %v694_v19 }
  0x29   :  { %650 = vmatpush3.bf16.msra.mxu0 %v731_v63 }
  0x2a   :  { %379 = vmatpush1.bf16.msra.mxu1 %v696_v20  ;;  %651 = vmatprep.subr.bf16.mxu0 %v732_v0 }
  0x2b   :  { %380 = vmatprep.subr.bf16.mxu1 %v697_v21 }
  0x2d   :  { %652 = vmatpush3.bf16.msra.mxu0 %v733_v1 }
  0x2e   :  { %381 = vmatpush1.bf16.msra.mxu1 %v699_v22  ;;  %653 = vmatprep.subr.bf16.mxu0 %v734_v2 }
  0x2f   :  { %382 = vmatprep.subr.bf16.mxu1 %v700_v23 }
  0x31   :  { %654 = vmatpush3.bf16.msra.mxu0 %v735_v3 }
  0x32   :  { %383 = vmatpush2.bf16.msra.mxu1 %v702_v24  ;;  %655 = vmatprep.subr.bf16.mxu0 %v736_v4 }
  0x33   :  { %384 = vmatprep.subr.bf16.mxu1 %v703_v25 }
  0x35   :  { %656 = vmatpush3.bf16.msra.mxu0 %v737_v5 }
  0x36   :  { %385 = vmatpush2.bf16.msra.mxu1 %v705_v26  ;;  %657 = vmatprep.subr.bf16.mxu0 %v738_v6 }
  0x37   :  { %386 = vmatprep.subr.bf16.mxu1 %v706_v27 }
  0x39   :  { %658 = vmatpush3.bf16.msra.mxu0 %v739_v7 }
  0x3a   :  { %387 = vmatpush2.bf16.msra.mxu1 %v708_v28  ;;  %v625_v28 = vld [vmem:[%s925_s6] ss:$0 sm:$0xff] }
  0x3b   :  { %388 = vmatprep.subr.bf16.mxu1 %v709_v29 }
  0x3e   :  { %389 = vmatpush2.bf16.msra.mxu1 %v711_v30 }
  0x3f   :  { %390 = vmatprep.subr.bf16.mxu1 %v712_v31 }
  0x42   :  { %391 = vmatpush2.bf16.msra.mxu1 %v714_v32 }
  0x43   :  { %392 = vmatprep.subr.bf16.mxu1 %v715_v33 }
  0x46   :  { %393 = vmatpush2.bf16.msra.mxu1 %v717_v34 }
  0x47   :  { %394 = vmatprep.subr.bf16.mxu1 %v718_v35 }
  0x4a   :  { %395 = vmatpush2.bf16.msra.mxu1 %v720_v36 }
  0x4b   :  { %396 = vmatprep.subr.bf16.mxu1 %v721_v37 }
  0x4e   :  { %397 = vmatpush2.bf16.msra.mxu1 %v723_v38 }
  0xd7   :  { %v184_v46 = vpop.f32.mrf.mxu0 }
  0xd8   :  { %v185_v47 = vadd.f32 %v184_v46, %v119_v44 }
  0xd9   :  { %v186_v48 = vpop.f32.mrf.mxu0 }
  0xda   :  { %v187_v49 = vadd.f32 %v186_v48, %v123_v45  ;;  %v191_v50 = vmax.f32 %v185_v47, 0.0 }
  0xdb   :  { %v188_v51 = vpop.f32.mrf.mxu0 }
  0xdc   :  { %v192_v52 = vmax.f32 %v187_v49, 0.0  ;;  %v193_v55 = vpack.c.bf16 %v191_v50, %v191_v50 }
  0xdd   :  { %v189_v53 = vpop.f32.mrf.mxu0 }
  0xde   :  { %v194_v54 = vpack.c.bf16 %v192_v52, %v192_v52 }
  0xe0   :  { %398 = vmatprep.mubr.bf16.mxu1 %v194_v54 }
  0xe1   :  { %399 = vmatmul.mubr.bf16.vlgmr.msra.gmra.mxu1 %v193_v55 }
 0x1a1   :  { %v400_v11 = vpop.f32.mrf.mxu1 }
 0x1a2   :  { %v401_v12 = vadd.f32 %v400_v11, %v199_v9 }
 0x1a3   :  { %v402_v13 = vpop.f32.mrf.mxu1 }
 0x1a4   :  { %v623_v14 = vmul.f32 -1.442695, %v401_v12  ;;  %v403_v15 = vadd.f32 %v402_v13, %v203_v10 }
 0x1a5   :  { %v404_v16 = vpop.f32.mrf.mxu1 }
 0x1a6   :  { %740 = vpow2.f32 %v623_v14  ;;  %v624_v17 = vmul.f32 -1.442695, %v403_v15 }
 0x1a7   :  { %v405_v18 = vpop.f32.mrf.mxu1 }
 0x1a8   :  { %742 = vpow2.f32 %v624_v17 }
 0x1b3   :  { %v741_v19 = vpop.eup %740 }
 0x1b4   :  { %v413_v20 = vadd.f32 1.0, %v741_v19 }
 0x1b5   :  { %v743_v21 = vpop.eup %742 }
 0x1b6   :  { %v414_v22 = vadd.f32 1.0, %v743_v21  ;;  %744 = vrcp.f32 %v413_v20 }
 0x1b8   :  { %746 = vrcp.f32 %v414_v22 }
 0x1c3   :  { %v745_v23 = vpop.eup %744 }
 0x1c4   :  { %v419_v26 = vpack.c.bf16 %v745_v23, %v745_v23 }
 0x1c5   :  { %v747_v24 = vpop.eup %746 }
 0x1c6   :  { %v420_v25 = vpack.c.bf16 %v747_v24, %v747_v24 }
 0x1c8   :  { %555 = vmatprep.mubr.bf16.mxu0 %v420_v25 }
 0x1c9   :  { %556 = vmatmul.mubr.bf16.vlgmr.msra.gmra.mxu0 %v419_v26 }
 0x289   :  { %v659_v27 = vpop.f32.mrf.mxu0 }
 0x28b   :  { %v660_v29 = vpop.f32.mrf.mxu0 }
 0x28c   :  { %v661_v30 = vadd.f32 %v660_v29, %v659_v27 }
 0x28d   :  { %v662_v31 = vpop.f32.mrf.mxu0 }
 0x28e   :  { %v558_v32 = vadd.f32 %v661_v30, %v625_v28 }
 0x28f   :  { %v663_v33 = vpop.f32.mrf.mxu0 }
 0x290   :  { %v642_v34 = vmul.f32 -1.442695, %v558_v32 }
 0x292   :  { %748 = vpow2.f32 %v642_v34 }
 0x29f   :  { %v749_v35 = vpop.eup %748 }
 0x2a0   :  { %v566_v36 = vadd.f32 1.0, %v749_v35 }
 0x2a2   :  { %750 = vrcp.f32 %v566_v36 }
 0x2af   :  { %v751_v37 = vpop.eup %750 }
 0x2b0   :  { %570 = vst.msk [vmem:[#allocation5] sm:$0x3] %vm569_vm1, %v751_v37 }
 0x2b1   :  { %783 = shalt.err (!%p780_p9)
}
 0x2b2   :  { %580 = dma.vmem_to_hbm [thread:$0]  %s578_s24, 32, %s926_s7, [#allocation4]  }
 0x2b3   :  { %794 = dma.done.wait [#allocation4], 32  }
 0x2b4   :  { %795 = vsyncadd [#allocation4], 4294967264 }
 0x2b5   :  { %584 = vsyncpa [#allocation3], 1 }
 0x2b6   :  { %585 = vsyncpa [#allocation4], 1 }

</bundles_post_ra>
